<compile_context>
chip_gen: v7x
topology: tpu7x:2x2x1
jax: 0.10.0
libtpu: 0.0.40
codegen_flags: <defaults>
</compile_context>

<pallas_src>
import functools
import math

import numpy as np
import jax
import jax.numpy as jnp
from jax.experimental import pallas as pl
from jax.experimental.pallas import tpu as pltpu


def _priorbox_kernel(tab_ref, o_ref, *, locs_per_tile, inv_fw, fw_f,
                     scale_x, scale_y, off_x, off_y, clip):
    """One grid step emits a lane-dense (2, tl) slab of the final flat layout.

    Lane l of grid step t is flat output element f = t*tl + l, with
    f = (loc * num_priors + p) * 4 + coord.  Row 0: boxes, row 1: variances.
    """
    t = pl.program_id(0)

    is_x = tab_ref[0:1, :] > 0.5            # (1, tl): coords 0/2 use cx, 1/3 use cy
    half = tab_ref[1:2, :]                  # (1, tl): signed half box extent
    var = tab_ref[2:3, :]                   # (1, tl): variances plane
    loc_in_tile = tab_ref[3:4, :]           # (1, tl): lane // c4 (exact, precomputed)

    # Flattened spatial location j*fw + i for every lane (f32, exact).
    loc = (t * locs_per_tile).astype(jnp.float32) + loc_in_tile
    # loc -> (j, i) split without integer div/mod: exact while fh*fw < 2**22
    # (guarded in the wrapper).
    jj = jnp.floor((loc + 0.5) * inv_fw)
    ii = loc - jj * fw_f
    cx = ii * scale_x + off_x               # (i + offset) * step / image_w
    cy = jj * scale_y + off_y               # (j + offset) * step / image_h

    boxes = jnp.where(is_x, cx, cy) + half
    if clip:                                # static (trace-time) branch
        boxes = jnp.clip(boxes, 0.0, 1.0)

    o_ref[0:1, :] = boxes
    o_ref[1:2, :] = var


def priorbox(feature, image, *, min_size, max_size, aspects, clip, flip,
             step, offset, variances):
    """Returns the (1, 2, fh*fw*num_priors*4) prior tensor, PyTorch layout."""
    fh, fw = int(feature.shape[2]), int(feature.shape[3])
    ih, iw = int(image.shape[2]), int(image.shape[3])
    # Float-reciprocal row/col split is exact only while fh*fw < 2**22.
    assert fh * fw < (1 << 22), "feature map too large for float index math"

    # Static per-prior (width, height), mirroring the PyTorch loop order.
    mw = float(min_size) / iw
    mh = float(min_size) / ih
    wh = [(mw, mh)]
    if max_size > min_size:
        wh.append((math.sqrt(mw * float(max_size) / iw),
                   math.sqrt(mh * float(max_size) / ih)))
        for a in aspects:
            wh.append((mw * math.sqrt(a), mh / math.sqrt(a)))
            if flip:
                wh.append((mw / math.sqrt(a), mh * math.sqrt(a)))
    num_priors = len(wh)
    c4 = num_priors * 4

    # Per (prior, coord) constants in the flat-channel order.
    pc_isx = np.zeros((c4,), np.float32)
    pc_half = np.zeros((c4,), np.float32)
    pc_var = np.zeros((c4,), np.float32)
    for p, (w_, h_) in enumerate(wh):
        for coord in range(4):
            c = p * 4 + coord
            pc_isx[c] = 1.0 if coord % 2 == 0 else 0.0
            sign = -1.0 if coord < 2 else 1.0
            pc_half[c] = sign * 0.5 * (w_ if coord % 2 == 0 else h_)
            pc_var[c] = float(variances[coord])

    hw = fh * fw
    L = hw * c4                                     # total flat output length per plane

    # Tile selection: tl is a multiple of lcm(c4, 128) so the per-lane constant
    # table repeats exactly per tile; ~1 MiB of output per grid step, >=2 tiles
    # (even count preferred) so v7x megacore can split the "parallel" axis.
    g = math.lcm(c4, 128)
    n_g = pl.cdiv(L, g)
    cap_g = max(1, (128 * 1024) // g)               # ~128K lanes ≈ 1 MiB written/step
    want = max(1, pl.cdiv(n_g, cap_g))
    if n_g >= 2:
        want = max(2, want)
        if want % 2:
            want += 1
    tl = pl.cdiv(n_g, want) * g
    n_tiles = pl.cdiv(L, tl)
    L_pad = n_tiles * tl

    # Host-precomputed per-lane table (same for every tile since tl % c4 == 0).
    reps = tl // c4
    lane = np.arange(tl, dtype=np.int64)
    tab = np.stack([
        np.tile(pc_isx, reps),
        np.tile(pc_half, reps),
        np.tile(pc_var, reps),
        (lane // c4).astype(np.float32),
    ], axis=0).astype(np.float32)                   # (4, tl)

    kernel = functools.partial(
        _priorbox_kernel,
        locs_per_tile=tl // c4,
        inv_fw=float(1.0 / fw),
        fw_f=float(fw),
        scale_x=float(step) / iw,
        scale_y=float(step) / ih,
        off_x=float(offset) * float(step) / iw,
        off_y=float(offset) * float(step) / ih,
        clip=bool(clip),
    )

    cost = pl.CostEstimate(flops=16 * L_pad,
                           transcendentals=0,
                           bytes_accessed=2 * L_pad * 4 + 4 * tl * 4)

    out = pl.pallas_call(
        kernel,
        out_shape=jax.ShapeDtypeStruct((2, L_pad), jnp.float32),
        grid_spec=pltpu.PrefetchScalarGridSpec(
            num_scalar_prefetch=0,
            grid=(n_tiles,),
            in_specs=[pl.BlockSpec((4, tl), lambda t: (0, 0))],
            out_specs=pl.BlockSpec((2, tl), lambda t: (0, t)),
        ),
        compiler_params=pltpu.CompilerParams(
            dimension_semantics=("parallel",),
        ),
        cost_estimate=cost,
    )(jnp.asarray(tab))

    if L_pad != L:          # drop lane padding (no-op when L is a tile multiple)
        out = out[:, :L]
    return out.reshape(1, 2, L)   # free reshape -- already the PyTorch layout


if __name__ == "__main__":
    # SSD-style PriorBox config.
    min_size, max_size = 30.0, 60.0
    aspects = [2.0, 3.0]
    clip, flip = True, True
    step, offset = 8, 0.5
    variances = [0.1, 0.1, 0.2, 0.2]

    # Small deterministic inputs; only the shapes are consumed by PriorBox.
    key = jax.random.PRNGKey(0)
    k1, k2 = jax.random.split(key)
    feature = jax.random.normal(k1, (2, 4, 16, 16), dtype=jnp.float32)
    image = jax.random.normal(k2, (2, 3, 128, 128), dtype=jnp.float32)

    out = priorbox(feature, image, min_size=min_size, max_size=max_size,
                   aspects=aspects, clip=clip, flip=flip, step=step,
                   offset=offset, variances=variances)
    out = jax.block_until_ready(out)

    # Pure-Python reference mirroring the PyTorch forward exactly.
    fh, fw = feature.shape[2], feature.shape[3]
    ih, iw = image.shape[2], image.shape[3]
    mean = []
    for j in range(fh):
        for i in range(fw):
            cx = (i + offset) * step / iw
            cy = (j + offset) * step / ih
            mw = float(min_size) / iw
            mh = float(min_size) / ih
            mean += [cx - mw / 2.0, cy - mh / 2.0, cx + mw / 2.0, cy + mh / 2.0]
            if max_size > min_size:
                ww = math.sqrt(mw * float(max_size) / iw)
                hh = math.sqrt(mh * float(max_size) / ih)
                mean += [cx - ww / 2.0, cy - hh / 2.0, cx + ww / 2.0, cy + hh / 2.0]
                for a in aspects:
                    ww = mw * math.sqrt(a)
                    hh = mh / math.sqrt(a)
                    mean += [cx - ww / 2.0, cy - hh / 2.0, cx + ww / 2.0, cy + hh / 2.0]
                    if flip:
                        ww = mw / math.sqrt(a)
                        hh = mh * math.sqrt(a)
                        mean += [cx - ww / 2.0, cy - hh / 2.0, cx + ww / 2.0, cy + hh / 2.0]
    out1 = np.asarray(mean, np.float32).reshape(-1, 4)
    out2 = np.tile(np.asarray(variances, np.float32).reshape(1, 4), (out1.shape[0], 1))
    if clip:
        out1 = np.clip(out1, 0.0, 1.0)
    ref = np.concatenate([out1.reshape(1, 1, -1), out2.reshape(1, 1, -1)], axis=1)

    assert out.shape == ref.shape, (out.shape, ref.shape)
    np.testing.assert_allclose(np.asarray(out), ref, atol=1e-5, rtol=1e-5)

    print("KERNEL_OK")
</pallas_src>

<mosaic_0001>
module attributes {stable_mosaic.version = 11 : i64} {
  func.func @_priorbox_kernel(%arg0: i32, %arg1: memref<4x3072xf32, #tpu.memory_space<vmem>>, %arg2: memref<2x3072xf32, #tpu.memory_space<vmem>>) attributes {dimension_semantics = [#tpu.dimension_semantics<parallel>], iteration_bounds = array<i64: 2>, scalar_prefetch = 0 : i64, scratch_operands = 0 : i64, tpu.core_type = #tpu.core_type<tc>, window_params = [{pipeline_mode = #tpu.pipeline_mode<synchronous>, transform_indices = @transform_0, window_bounds = array<i64: 4, 3072>}, {transform_indices = @transform_1, window_bounds = array<i64: 2, 3072>}]} {
    %c0 = arith.constant 0 : index
    %c0_0 = arith.constant 0 : index
    %0 = vector.load %arg1[%c0, %c0_0] : memref<4x3072xf32, #tpu.memory_space<vmem>>, vector<1x3072xf32>
    %cst = arith.constant 5.000000e-01 : f32
    %1 = vector.broadcast %cst : f32 to vector<1x3072xf32>
    %2 = arith.cmpf ogt, %0, %1 : vector<1x3072xf32>
    %c1 = arith.constant 1 : index
    %c0_1 = arith.constant 0 : index
    %3 = vector.load %arg1[%c1, %c0_1] : memref<4x3072xf32, #tpu.memory_space<vmem>>, vector<1x3072xf32>
    %c2 = arith.constant 2 : index
    %c0_2 = arith.constant 0 : index
    %4 = vector.load %arg1[%c2, %c0_2] : memref<4x3072xf32, #tpu.memory_space<vmem>>, vector<1x3072xf32>
    %c3 = arith.constant 3 : index
    %c0_3 = arith.constant 0 : index
    %5 = vector.load %arg1[%c3, %c0_3] : memref<4x3072xf32, #tpu.memory_space<vmem>>, vector<1x3072xf32>
    %c128_i32 = arith.constant 128 : i32
    %6 = arith.muli %arg0, %c128_i32 : i32
    %7 = arith.sitofp %6 : i32 to f32
    %8 = vector.broadcast %7 : f32 to vector<1x3072xf32>
    %9 = arith.addf %8, %5 : vector<1x3072xf32>
    %cst_4 = arith.constant 5.000000e-01 : f32
    %10 = vector.broadcast %cst_4 : f32 to vector<1x3072xf32>
    %11 = arith.addf %9, %10 : vector<1x3072xf32>
    %cst_5 = arith.constant 6.250000e-02 : f32
    %12 = vector.broadcast %cst_5 : f32 to vector<1x3072xf32>
    %13 = arith.mulf %11, %12 : vector<1x3072xf32>
    %14 = math.floor %13 : vector<1x3072xf32>
    %cst_6 = arith.constant 1.600000e+01 : f32
    %15 = vector.broadcast %cst_6 : f32 to vector<1x3072xf32>
    %16 = arith.mulf %14, %15 : vector<1x3072xf32>
    %17 = arith.subf %9, %16 : vector<1x3072xf32>
    %cst_7 = arith.constant 6.250000e-02 : f32
    %18 = vector.broadcast %cst_7 : f32 to vector<1x3072xf32>
    %19 = arith.mulf %17, %18 : vector<1x3072xf32>
    %cst_8 = arith.constant 3.125000e-02 : f32
    %20 = vector.broadcast %cst_8 : f32 to vector<1x3072xf32>
    %21 = arith.addf %19, %20 : vector<1x3072xf32>
    %cst_9 = arith.constant 6.250000e-02 : f32
    %22 = vector.broadcast %cst_9 : f32 to vector<1x3072xf32>
    %23 = arith.mulf %14, %22 : vector<1x3072xf32>
    %cst_10 = arith.constant 3.125000e-02 : f32
    %24 = vector.broadcast %cst_10 : f32 to vector<1x3072xf32>
    %25 = arith.addf %23, %24 : vector<1x3072xf32>
    %26 = arith.select %2, %21, %25 : vector<1x3072xi1>, vector<1x3072xf32>
    %27 = arith.addf %26, %3 : vector<1x3072xf32>
    %cst_11 = arith.constant 0.000000e+00 : f32
    %cst_12 = arith.constant 1.000000e+00 : f32
    %28 = vector.broadcast %cst_11 : f32 to vector<1x3072xf32>
    %29 = arith.maximumf %28, %27 : vector<1x3072xf32>
    %30 = vector.broadcast %cst_12 : f32 to vector<1x3072xf32>
    %31 = arith.minimumf %30, %29 : vector<1x3072xf32>
    %c0_13 = arith.constant 0 : index
    %c0_14 = arith.constant 0 : index
    %32 = vector.load %arg2[%c0_13, %c0_14] : memref<2x3072xf32, #tpu.memory_space<vmem>>, vector<1x3072xf32>
    tpu.vector_store %arg2[%c0_13, %c0_14], %31 {strides = array<i32>} : memref<2x3072xf32, #tpu.memory_space<vmem>>, vector<1x3072xf32>,
    %c1_15 = arith.constant 1 : index
    %c0_16 = arith.constant 0 : index
    %33 = vector.load %arg2[%c1_15, %c0_16] : memref<2x3072xf32, #tpu.memory_space<vmem>>, vector<1x3072xf32>
    tpu.vector_store %arg2[%c1_15, %c0_16], %4 {strides = array<i32>} : memref<2x3072xf32, #tpu.memory_space<vmem>>, vector<1x3072xf32>,
    return
  }
  func.func @transform_0(%arg0: i32) -> (i32, i32) {
    %c0_i32 = arith.constant 0 : i32
    %c0_i32_0 = arith.constant 0 : i32
    %c0_i32_1 = arith.constant 0 : i32
    return %c0_i32, %c0_i32_0 : i32, i32
  }
  func.func @transform_1(%arg0: i32) -> (i32, i32) {
    %c0_i32 = arith.constant 0 : i32
    %c0_i32_0 = arith.constant 0 : i32
    return %c0_i32, %arg0 : i32, i32
  }
}

</mosaic_0001>

<bundles_post_ra>
// kernel: tpu_custom_call.1
= control target key start
LH: loop header
LB: loop body
LE: loop exit
PB: predicated region body
PF: predicated region fallthrough
CT: control target
= control target key end

     0   :  { %6 = vsyncpa [#allocation3], 0  ;;  %s583_s0 = inlined_call_operand.hbm [shape: f32[4,3072], index: 0, kind: input, shape index: {}]   ;;  %s584_s1 = inlined_call_operand.hbm [shape: f32[2,6144], index: 1, kind: output, shape index: {}]  }
   0x1   :  { %7 = vsyncpa [#allocation4], 0 }
   0x2   :  { %9 = vsyncpa [#allocation4 + $0x1], 0  ;;  %s439_s6 = smov 0   ;;  %s441_s7 = smov 0  }
   0x3   :  { %s443_s8 = smov 0   ;;  %s445_s9 = smov 0  }
   0x4 LB: > { %s460_s10 = sadd.s32 4294967295, %s425_s9   ;;  %s265_s11 = sadd.s32 4294967294, %s425_s9   ;;  %s425_s9 = sphi %s445_s9, %s600_s9   ;;  %s421_s8 = sphi %s443_s8, %s599_s8   ;;  %s417_s7 = sphi %s441_s7, %s598_s7   ;;  %s413_s6 = sphi %s439_s6, %s597_s6  }
   0x5   : > { %s464_s12 = sadd.s32 1, %s425_s9   ;;  %s43_s13 = sadd.s32 1, %s421_s8 }
   0x6   : > { %s40_s14 = ssub.s32 %s425_s9, %s464_s12  ;;  %p53_p0 = scmp.ne.s32.totalorder %s421_s8, %s417_s7 }
   0x7   : > { %p41_p1 = scmp.eq.s32.totalorder %s40_s14, 0  ;;  %p54_p2 = scmp.eq.s32.totalorder %s460_s10, 1 }
   0x8   : > { %p59_p3 = scmp.ne.s32.totalorder %s417_s7, %s413_s6  ;;  %p60_p4 = scmp.eq.s32.totalorder %s265_s11, 1 }
   0x9   : > { %s475_s15 = scalar_select %p41_p1, %s421_s8, %s43_s13  }
   0xa   : > { %p477_p5 = por %p54_p2, %p53_p0  ;;  %p481_p6 = por %p60_p4, %p59_p3 }
   0xb   : > { %p266_p7 = scmp.ge.s32.totalorder %s425_s9, 1  ;;  %p67_p8 = scmp.lt.s32.totalorder %s425_s9, 3 }
   0xc   : > { %s588_s16 = scalar_select %p477_p5, 1, 0 }
   0xd   : > { %s589_s17 = scalar_select %p481_p6, 1, 0 }
   0xe   : > { %p585_p9 = scmp.eq.s32.totalorder %s460_s10, 0  ;;  %p488_p10 = pnand %p266_p7, %p67_p8 }
   0xf   : > { %s427_s19 = smov [#allocation2]   ;;  %s331_s24 = scalar_lea.hbm %s583_s0, 1536 }
  0x10   : > { %s590_s18 = scalar_select %p488_p10, 1, 0 }
  0x11   : > { %s80_s20 = sshll.u32 %s427_s19, 4  ;;  %p287_p11 = pneg %p488_p10  ;;  %s81_s20 = int_to_ptr.vmem [resolvable:$true] %s80_s20 }
  0x12   : > { %p332_p13 = scmp.ne.s32.totalorder %s583_s0, %s331_s24  ;;  %p338_p3 = scmp.lt.u32.totalorder %s331_s24, %s583_s0 }
  0x13   : > { %p496_p12 = pnand %p585_p9, %p287_p11 }
  0x15   : > { %p333_p0 = pneg %p496_p12 }
  0x17   : > { %p334_p1 = pnand %p333_p0, %p332_p13 }
  0x19   : > { %p335_p2 = pneg %p334_p1 }
  0x1b   : > { %p340_p4 = pnand %p338_p3, %p335_p2 }
  0x1d   : > { %343 = shalt.err (!%p340_p4)
}
  0x1e   : > { %s344_s29 = scalar_lea.vmem %s81_s20, 1536  ;;  %p352_p9 = scmp.lt.s32.totalorder %s81_s20, %s81_s20 }
  0x1f   : > { %p345_p7 = scmp.ne.s32.totalorder %s81_s20, %s344_s29  ;;  %p353_p6 = scmp.lt.s32.totalorder %s344_s29, %s344_s29 }
  0x21   : > { %p347_p8 = pnand %p345_p7, %p333_p0  ;;  %p354_p5 = por %p353_p6, %p352_p9 }
  0x23   : > { %p348_p11 = pneg %p347_p8 }
  0x25   : > { %p355_p10 = pnand %p354_p5, %p348_p11 }
  0x27   : > { %358 = shalt.err (!%p355_p10)
}
  0x28   : > { %290 = dma.hbm_to_vmem [thread:$0]  (!%p496_p12), %s583_s0, 1536, %s81_s20, [#allocation3]  }
  0x29   : > { %p592_p13 = scmp.ne.s32.totalorder %s590_s18, 0 }
  0x2a   : > { %p593_p1 = scmp.eq.s32.totalorder (!%p592_p13), %s460_s10, 0 }
  0x2b   : > { %93 = sbr.rel (%p592_p13) target bundleno = 93 (0x5d), region = 24 }
  0x32   : > { %404 = dma.done.wait (%p593_p1), [#allocation3], 1536   ;;  %p594_p0 = pmov %p593_p1 }
  0x33   : > { %s270_s3 = sshll.u32 %s460_s10, 7  ;;  %s105_s5 = sand.u32 1, %s417_s7   ;;  %v130_v1 = vld [vmem:[#allocation2 + $0x3] ss:$4 sm:$0xff]  ;;  %v124_v8 = vld [vmem:[#allocation2 + $0x2] ss:$4 sm:$0xff] }
  0x34   : > { %406 = vsyncadd (%p594_p0), [#allocation3], 4294965760  ;;  %s136_s4 = scvt.s32.f32 %s270_s3  ;;  %s280_s11 = smul.u32 48, %s105_s5  ;;  %v132_v3 = vld [vmem:[#allocation2 + $0x23] ss:$4 sm:$0xff] }
  0x35   : > { %v134_v6 = vld [vmem:[#allocation2 + $0x43] ss:$4 sm:$0xff]  ;;  %v126_v9 = vld [vmem:[#allocation2 + $0x22] ss:$4 sm:$0xff]  ;;  %v109_v21 = vld [vmem:[#allocation2] ss:$4 sm:$0xff] }
  0x36   : > { %v137_v0 = vstv %s136_s4  ;;  %v128_v10 = vld [vmem:[#allocation2 + $0x42] ss:$4 sm:$0xff]  ;;  %s526_s13 = scalar_lea.vmem [#allocation5], %s280_s11  ;;  %v111_v29 = vld [vmem:[#allocation2 + $0x20] ss:$4 sm:$0xff]  ;;  %vm114_vm0 = vcmp.gt.f32.partialorder %v109_v21, 0.5 }
  0x37   : > { %v138_v2 = vadd.f32 %v137_v0, %v130_v1  ;;  %v139_v5 = vadd.f32 %v137_v0, %v132_v3  ;;  %v140_v7 = vadd.f32 %v137_v0, %v134_v6  ;;  %273 = vst [vmem:[%s526_s13 + $0x1] ss:$2 sm:$0xff] %v124_v8  ;;  %274 = vst [vmem:[%s526_s13 + $0x11] ss:$2 sm:$0xff] %v126_v9  ;;  %v113_v31 = vld [vmem:[#allocation2 + $0x40] ss:$4 sm:$0xff] }
  0x38   : > { %275 = vst [vmem:[%s526_s13 + $0x21] ss:$2 sm:$0xff] %v128_v10  ;;  %v118_v33 = vld [vmem:[#allocation2 + $0x1] ss:$4 sm:$0xff]  ;;  %vm115_vm1 = vcmp.gt.f32.partialorder %v111_v29, 0.5  ;;  %vm116_vm2 = vcmp.gt.f32.partialorder %v113_v31, 0.5 }
  0x39   : > { %v141_v4 = vadd.f32 0.5, %v138_v2  ;;  %v142_v12 = vadd.f32 0.5, %v139_v5  ;;  %v143_v13 = vadd.f32 0.5, %v140_v7  ;;  %v120_v40 = vld [vmem:[#allocation2 + $0x21] ss:$4 sm:$0xff]  ;;  %s279_s14 = smul.u32 768, %s460_s10 }
  0x3a   : > { %v122_v43 = vld [vmem:[#allocation2 + $0x41] ss:$4 sm:$0xff]  ;;  %s206_s18 = sshll.u32 %s526_s13, 4  ;;  %s192_s10 = scalar_lea.sflag [#allocation4], %s105_s5  ;;  %s534_s18 = int_to_ptr.vmem [resolvable:$true] %s206_s18 }
  0x3b   : > { %v144_v11 = vmul.f32 0.0625, %v141_v4  ;;  %v145_v15 = vmul.f32 0.0625, %v142_v12  ;;  %v146_v16 = vmul.f32 0.0625, %v143_v13  ;;  %s539_s21 = scalar_lea.hbm %s584_s1, %s279_s14  ;;  %s359_s22 = scalar_lea.vmem %s534_s18, 768 }
  0x3c   : > { %p360_p5 = scmp.ne.s32.totalorder %s534_s18, %s359_s22  ;;  %p595_p6 = scmp.ne.s32.totalorder %s588_s16, 0 }
  0x3d   : > { %v147_v14 = vfloor.f32 %v144_v11  ;;  %v148_v19 = vfloor.f32 %v145_v15  ;;  %v149_v20 = vfloor.f32 %v146_v16  ;;  %s428_s23 = smov [#allocation5]  }
  0x3e   : > { %p361_p9 = pnand %p360_p5, %p595_p6  ;;  %s363_s24 = sshll.u32 %s428_s23, 4  ;;  %s364_s24 = int_to_ptr.vmem [resolvable:$false] %s363_s24 }
  0x3f   : > { %v150_v17 = vmul.f32 16.0, %v147_v14  ;;  %v162_v18 = vmul.f32 0.0625, %v147_v14  ;;  %v151_v23 = vmul.f32 16.0, %v148_v19  ;;  %v163_v24 = vmul.f32 0.0625, %v148_v19  ;;  %s365_s25 = scalar_lea.vmem %s364_s24, 1536  ;;  %p366_p12 = scmp.lt.s32.totalorder %s534_s18, %s364_s24 }
  0x40   : > { %v152_v25 = vmul.f32 16.0, %v149_v20  ;;  %v164_v26 = vmul.f32 0.0625, %v149_v20  ;;  %p362_p10 = pneg %p361_p9  ;;  %p367_p2 = scmp.lt.s32.totalorder %s365_s25, %s359_s22 }
  0x41   : > { %v153_v22 = vsub.f32 %v138_v2, %v150_v17  ;;  %v165_v28 = vadd.f32 0.03125, %v162_v18  ;;  %v154_v30 = vsub.f32 %v139_v5, %v151_v23  ;;  %v166_v36 = vadd.f32 0.03125, %v163_v24 }
  0x42   : > { %v155_v32 = vsub.f32 %v140_v7, %v152_v25  ;;  %v167_v38 = vadd.f32 0.03125, %v164_v26  ;;  %p368_p3 = por %p367_p2, %p366_p12 }
  0x43   : > { %v156_v27 = vmul.f32 0.0625, %v153_v22  ;;  %v157_v35 = vmul.f32 0.0625, %v154_v30 }
  0x44   : > { %v158_v37 = vmul.f32 0.0625, %v155_v32  ;;  %p369_p4 = pnand %p368_p3, %p362_p10 }
  0x45   : > { %v159_v34 = vadd.f32 0.03125, %v156_v27  ;;  %v160_v41 = vadd.f32 0.03125, %v157_v35 }
  0x46   : > { %v161_v44 = vadd.f32 0.03125, %v158_v37 }
  0x47   : > { %v168_v39 = vsel %vm114_vm0, %v159_v34, %v165_v28  ;;  %v169_v45 = vsel %vm115_vm1, %v160_v41, %v166_v36 }
  0x48   : > { %v171_v42 = vadd.f32 %v168_v39, %v118_v33  ;;  %v172_v47 = vadd.f32 %v169_v45, %v120_v40  ;;  %v170_v48 = vsel %vm116_vm2, %v161_v44, %v167_v38 }
  0x49   : > { %v173_v49 = vadd.f32 %v170_v48, %v122_v43 }
  0x4a   : > { %v174_v46 = vmax.f32 %v171_v42, 0.0  ;;  %v175_v51 = vmax.f32 %v172_v47, 0.0 }
  0x4b   : > { %v176_v52 = vmax.f32 %v173_v49, 0.0 }
  0x4c   : > { %v177_v50 = vmin.f32 %v174_v46, 1.0  ;;  %v178_v53 = vmin.f32 %v175_v51, 1.0 }
  0x4d   : > { %v179_v54 = vmin.f32 %v176_v52, 1.0 }
  0x4e   : > { %180 = vst [vmem:[%s526_s13] ss:$2 sm:$0xff] %v177_v50  ;;  %271 = vst [vmem:[%s526_s13 + $0x10] ss:$2 sm:$0xff] %v178_v53 }
  0x4f   : > { %272 = vst [vmem:[%s526_s13 + $0x20] ss:$2 sm:$0xff] %v179_v54 }
  0x50   : > { %372 = shalt.err (!%p369_p4)
}
  0x51   : > { %s373_s26 = scalar_lea.hbm %s539_s21, 768  ;;  %s377_s29 = scalar_lea.hbm %s584_s1, 1536 }
  0x52   : > { %p374_p7 = scmp.ne.s32.totalorder %s539_s21, %s373_s26  ;;  %p378_p13 = scmp.lt.u32.totalorder %s539_s21, %s584_s1 }
  0x53   : > { %p379_p1 = scmp.lt.u32.totalorder %s377_s29, %s373_s26  ;;  %p381_p5 = scmp.lt.u32.totalorder %s373_s26, %s539_s21 }
  0x54   : > { %p375_p8 = pnand %p374_p7, %p595_p6 }
  0x55   : > { %p380_p0 = por %p379_p1, %p378_p13 }
  0x56   : > { %p376_p11 = pneg %p375_p8 }
  0x57   : > { %p382_p9 = por %p381_p5, %p380_p0 }
  0x59   : > { %p383_p10 = pnand %p382_p9, %p376_p11 }
  0x5b   : > { %386 = shalt.err (!%p383_p10)
}
  0x5c   : > { %285 = dma.vmem_to_hbm [thread:$0]  (%p595_p6), %s534_s18, 768, %s539_s21, %s192_s10  }
  0x5d PF: > { %p297_p12 = scmp.ge.s32.totalorder %s425_s9, 2  ;;  %s218_s3 = sand.u32 1, %s413_s6  }
  0x5e   : > { %p596_p2 = scmp.ne.s32.totalorder %s589_s17, 0  ;;  %s219_s4 = scalar_lea.sflag [#allocation4], %s218_s3 }
  0x60   : > { %p292_p3 = pnand %p297_p12, %p596_p2 }
  0x62   : > { %408 = dma.done.wait (!%p292_p3), %s219_s4, 768  }
  0x63   : > { %410 = vsyncadd (!%p292_p3), %s219_s4, 4294966528  ;;  %p12_p4 = scmp.ge.s32.totalorder %s464_s12, 4   ;;  %s597_s6 = smov %s417_s7 }
  0x64   : > { %s598_s7 = smov %s421_s8  ;;  %s599_s8 = smov %s475_s15 }
  0x65   : > { %s600_s9 = smov %s464_s12  ;;  %14 = sbr.rel (!%p12_p4) target bundleno = 4 (0x4), region = 77 }
  0x6c   :  { %224 = vsyncpa [#allocation3], 1 }
  0x6d   :  { %226 = vsyncpa [#allocation3 + $0x1], 1 }
  0x6e   :  { %227 = vsyncpa [#allocation4], 1 }
  0x6f   :  { %229 = vsyncpa [#allocation4 + $0x1], 1 }

</bundles_post_ra>
